<compile_context>
chip_gen: v7x
topology: tpu7x:2x2x1
jax: 0.10.0
libtpu: 0.0.40
codegen_flags: <defaults>
</compile_context>

<pallas_src>
import functools

import jax
import jax.numpy as jnp
from jax.experimental import pallas as pl
from jax.experimental.pallas import tpu as pltpu

NEG_SLOPE = 0.01  # nn.LeakyReLU() default negative_slope


def _halo(width):
    # Lane halo on each side of the flat image, rounded up to the 128-lane tile so
    # the interior writes into the scratch are lane-aligned (full-width stores).
    return ((width + 1 + 127) // 128) * 128


def _input_attention_kernel(x_ref, w1_ref, w2_ref, o_ref, pad_ref, *, width):
    # x_ref  : (R, HW)          R = B*C rows (sublanes), HW = H*W lanes
    # w*_ref : (R, 9*R)         per-tap block-diagonal weights, tap-major columns
    # o_ref  : (R, HW)
    # pad_ref: (R, HW + 2*M)    VMEM scratch: zero-bordered flat image, M = _halo(W)
    R, HW = x_ref.shape
    W = width
    M = _halo(W)

    # Column masks that cancel the row-wrap of the flat +/-1 lane shifts (hoisted).
    col = jax.lax.broadcasted_iota(jnp.int32, (R, HW), 1)
    w_idx = (col & (W - 1)) if (W & (W - 1)) == 0 else (col % W)
    not_first_col = w_idx != 0          # valid positions for dw = -1 taps
    not_last_col = w_idx != (W - 1)     # valid positions for dw = +1 taps

    # Zero only the two M-wide borders; the interior is fully overwritten below.
    zpad = jnp.zeros((R, M), jnp.float32)
    pad_ref[:, :M] = zpad
    pad_ref[:, M + HW:] = zpad

    def conv3x3(w_ref):
        # Gather the 9 shifted taps of the image currently held in pad_ref and
        # contract all of them in a single (R, 9R) @ (9R, HW) matmul.
        taps = []
        for dh in (-1, 0, 1):
            for dw in (-1, 0, 1):
                off = dh * W + dw
                s = pad_ref[:, M + off: M + off + HW]      # (R, HW) lane-dense
                if dw == -1:
                    s = jnp.where(not_first_col, s, 0.0)
                elif dw == 1:
                    s = jnp.where(not_last_col, s, 0.0)
                taps.append(s)
        stacked = jnp.concatenate(taps, axis=0)            # (9R, HW), sublane-aligned
        return jnp.dot(w_ref[...], stacked,
                       preferred_element_type=jnp.float32)  # (R, HW)

    # ---- conv1 (3x3, pad=1, no bias) + LeakyReLU ----
    pad_ref[:, M: M + HW] = x_ref[...]
    y1 = conv3x3(w1_ref)
    y1 = jnp.where(y1 > 0, y1, NEG_SLOPE * y1)

    # ---- conv2 (3x3, pad=1, no bias) + Sigmoid ----
    pad_ref[:, M: M + HW] = y1
    y2 = conv3x3(w2_ref)
    o_ref[...] = jax.nn.sigmoid(y2)


def _block_diag_weights(w_oihw, batch):
    """(Cout, Cin, 3, 3) OIHW conv weight -> (B*Cout, 9*B*Cin) tap-major matrix."""
    eye = jnp.eye(batch, dtype=w_oihw.dtype)
    blocks = [jnp.kron(eye, w_oihw[:, :, kh, kw])       # (B*Cout, B*Cin) per tap
              for kh in range(3) for kw in range(3)]
    return jnp.concatenate(blocks, axis=1)               # (B*C, 9*B*C)


def input_attention(x_nchw, w1_oihw, w2_oihw):
    """x: (B, C, H, W) f32; w*: (C, C, 3, 3) f32 (PyTorch OIHW). Returns (B, C, H, W)."""
    B, C, H, W = x_nchw.shape
    R, HW = B * C, H * W
    pad_cols = HW + 2 * _halo(W)

    x_flat = x_nchw.reshape(R, HW)            # NCHW row-major == lane-dense slab (free)
    w1b = _block_diag_weights(w1_oihw, B)     # (R, 9R)
    w2b = _block_diag_weights(w2_oihw, B)

    out_flat = pl.pallas_call(
        functools.partial(_input_attention_kernel, width=W),
        out_shape=jax.ShapeDtypeStruct((R, HW), jnp.float32),
        in_specs=[pl.BlockSpec(memory_space=pltpu.MemorySpace.VMEM)] * 3,
        out_specs=pl.BlockSpec(memory_space=pltpu.MemorySpace.VMEM),
        scratch_shapes=[pltpu.VMEM((R, pad_cols), jnp.float32)],
    )(x_flat, w1b, w2b)

    return out_flat.reshape(B, C, H, W)       # free reshape back to NCHW


def _reference(x_nchw, w1_oihw, w2_oihw):
    """Pure-JAX reference matching PyTorch NCHW conv semantics."""
    dn = jax.lax.conv_dimension_numbers(x_nchw.shape, w1_oihw.shape,
                                        ("NCHW", "OIHW", "NCHW"))
    y = jax.lax.conv_general_dilated(x_nchw, w1_oihw, (1, 1), ((1, 1), (1, 1)),
                                     dimension_numbers=dn,
                                     precision=jax.lax.Precision.HIGHEST)
    y = jnp.where(y > 0, y, NEG_SLOPE * y)
    y = jax.lax.conv_general_dilated(y, w2_oihw, (1, 1), ((1, 1), (1, 1)),
                                     dimension_numbers=dn,
                                     precision=jax.lax.Precision.HIGHEST)
    return jax.nn.sigmoid(y)


if __name__ == "__main__":
    B, C, H, W = 2, 4, 16, 16   # planes = 4
    key = jax.random.PRNGKey(0)
    kx, k1, k2 = jax.random.split(key, 3)
    x = jax.random.normal(kx, (B, C, H, W), jnp.float32)

    # Deterministic Kaiming-style init for the two 3x3 convs (OIHW layout, no bias).
    fan_in = C * 3 * 3
    w1 = jax.random.normal(k1, (C, C, 3, 3), jnp.float32) * (2.0 / fan_in) ** 0.5
    w2 = jax.random.normal(k2, (C, C, 3, 3), jnp.float32) * (2.0 / fan_in) ** 0.5

    out = jax.block_until_ready(input_attention(x, w1, w2))
    ref = jax.block_until_ready(_reference(x, w1, w2))

    assert out.shape == (B, C, H, W)
    assert out.dtype == jnp.float32
    assert jnp.allclose(out, ref, atol=2e-3, rtol=2e-3), "mismatch vs JAX reference"
    print("KERNEL_OK")
</pallas_src>

<mosaic_0001>
module attributes {stable_mosaic.version = 11 : i64} {
  func.func @_input_attention_kernel(%arg0: memref<8x256xf32, #tpu.memory_space<vmem>>, %arg1: memref<8x72xf32, #tpu.memory_space<vmem>>, %arg2: memref<8x72xf32, #tpu.memory_space<vmem>>, %arg3: memref<8x256xf32, #tpu.memory_space<vmem>>, %arg4: memref<8x512xf32, #tpu.memory_space<vmem>>) attributes {dimension_semantics = [], scalar_prefetch = 0 : i64, scratch_operands = 1 : i64, tpu.core_type = #tpu.core_type<tc>} {
    %0 = tpu.iota {dimensions = array<i32: 1>} : vector<8x256xi32>
    %c15_i32 = arith.constant 15 : i32
    %1 = vector.broadcast %c15_i32 : i32 to vector<8x256xi32>
    %2 = arith.andi %0, %1 : vector<8x256xi32>
    %c0_i32 = arith.constant 0 : i32
    %3 = vector.broadcast %c0_i32 : i32 to vector<8x256xi32>
    %4 = arith.cmpi ne, %2, %3 : vector<8x256xi32>
    %c15_i32_0 = arith.constant 15 : i32
    %5 = vector.broadcast %c15_i32_0 : i32 to vector<8x256xi32>
    %6 = arith.cmpi ne, %2, %5 : vector<8x256xi32>
    %cst = arith.constant 0.000000e+00 : f32
    %7 = vector.broadcast %cst : f32 to vector<8x128xf32>
    %c0 = arith.constant 0 : index
    %c0_1 = arith.constant 0 : index
    %8 = vector.load %arg4[%c0, %c0_1] : memref<8x512xf32, #tpu.memory_space<vmem>>, vector<8x128xf32>
    tpu.vector_store %arg4[%c0, %c0_1], %7 {strides = array<i32>} : memref<8x512xf32, #tpu.memory_space<vmem>>, vector<8x128xf32>,
    %c0_2 = arith.constant 0 : index
    %c384 = arith.constant 384 : index
    %9 = vector.load %arg4[%c0_2, %c384] : memref<8x512xf32, #tpu.memory_space<vmem>>, vector<8x128xf32>
    tpu.vector_store %arg4[%c0_2, %c384], %7 {strides = array<i32>} : memref<8x512xf32, #tpu.memory_space<vmem>>, vector<8x128xf32>,
    %c0_3 = arith.constant 0 : index
    %c0_4 = arith.constant 0 : index
    %10 = vector.load %arg0[%c0_3, %c0_4] : memref<8x256xf32, #tpu.memory_space<vmem>>, vector<8x256xf32>
    %c0_5 = arith.constant 0 : index
    %c128 = arith.constant 128 : index
    %11 = vector.load %arg4[%c0_5, %c128] : memref<8x512xf32, #tpu.memory_space<vmem>>, vector<8x256xf32>
    tpu.vector_store %arg4[%c0_5, %c128], %10 {strides = array<i32>} : memref<8x512xf32, #tpu.memory_space<vmem>>, vector<8x256xf32>,
    %c0_6 = arith.constant 0 : index
    %c111 = arith.constant 111 : index
    %12 = vector.load %arg4[%c0_6, %c111] : memref<8x512xf32, #tpu.memory_space<vmem>>, vector<8x256xf32>
    %cst_7 = arith.constant 0.000000e+00 : f32
    %13 = vector.broadcast %cst_7 : f32 to vector<8x256xf32>
    %14 = arith.select %4, %12, %13 : vector<8x256xi1>, vector<8x256xf32>
    %c0_8 = arith.constant 0 : index
    %c112 = arith.constant 112 : index
    %15 = vector.load %arg4[%c0_8, %c112] : memref<8x512xf32, #tpu.memory_space<vmem>>, vector<8x256xf32>
    %c0_9 = arith.constant 0 : index
    %c113 = arith.constant 113 : index
    %16 = vector.load %arg4[%c0_9, %c113] : memref<8x512xf32, #tpu.memory_space<vmem>>, vector<8x256xf32>
    %cst_10 = arith.constant 0.000000e+00 : f32
    %17 = vector.broadcast %cst_10 : f32 to vector<8x256xf32>
    %18 = arith.select %6, %16, %17 : vector<8x256xi1>, vector<8x256xf32>
    %c0_11 = arith.constant 0 : index
    %c127 = arith.constant 127 : index
    %19 = vector.load %arg4[%c0_11, %c127] : memref<8x512xf32, #tpu.memory_space<vmem>>, vector<8x256xf32>
    %cst_12 = arith.constant 0.000000e+00 : f32
    %20 = vector.broadcast %cst_12 : f32 to vector<8x256xf32>
    %21 = arith.select %4, %19, %20 : vector<8x256xi1>, vector<8x256xf32>
    %c0_13 = arith.constant 0 : index
    %c128_14 = arith.constant 128 : index
    %22 = vector.load %arg4[%c0_13, %c128_14] : memref<8x512xf32, #tpu.memory_space<vmem>>, vector<8x256xf32>
    %c0_15 = arith.constant 0 : index
    %c129 = arith.constant 129 : index
    %23 = vector.load %arg4[%c0_15, %c129] : memref<8x512xf32, #tpu.memory_space<vmem>>, vector<8x256xf32>
    %cst_16 = arith.constant 0.000000e+00 : f32
    %24 = vector.broadcast %cst_16 : f32 to vector<8x256xf32>
    %25 = arith.select %6, %23, %24 : vector<8x256xi1>, vector<8x256xf32>
    %c0_17 = arith.constant 0 : index
    %c143 = arith.constant 143 : index
    %26 = vector.load %arg4[%c0_17, %c143] : memref<8x512xf32, #tpu.memory_space<vmem>>, vector<8x256xf32>
    %cst_18 = arith.constant 0.000000e+00 : f32
    %27 = vector.broadcast %cst_18 : f32 to vector<8x256xf32>
    %28 = arith.select %4, %26, %27 : vector<8x256xi1>, vector<8x256xf32>
    %c0_19 = arith.constant 0 : index
    %c144 = arith.constant 144 : index
    %29 = vector.load %arg4[%c0_19, %c144] : memref<8x512xf32, #tpu.memory_space<vmem>>, vector<8x256xf32>
    %c0_20 = arith.constant 0 : index
    %c145 = arith.constant 145 : index
    %30 = vector.load %arg4[%c0_20, %c145] : memref<8x512xf32, #tpu.memory_space<vmem>>, vector<8x256xf32>
    %cst_21 = arith.constant 0.000000e+00 : f32
    %31 = vector.broadcast %cst_21 : f32 to vector<8x256xf32>
    %32 = arith.select %6, %30, %31 : vector<8x256xi1>, vector<8x256xf32>
    %33 = tpu.concatenate %14, %15, %18, %21, %22, %25, %28, %29, %32 in 0 : vector<8x256xf32>, vector<8x256xf32>, vector<8x256xf32>, vector<8x256xf32>, vector<8x256xf32>, vector<8x256xf32>, vector<8x256xf32>, vector<8x256xf32>, vector<8x256xf32> -> vector<72x256xf32>
    %c0_22 = arith.constant 0 : index
    %c0_23 = arith.constant 0 : index
    %34 = vector.load %arg1[%c0_22, %c0_23] : memref<8x72xf32, #tpu.memory_space<vmem>>, vector<8x72xf32>
    %cst_24 = arith.constant dense<0.000000e+00> : vector<8x256xf32>
    %35 = tpu.matmul %34, %33, %cst_24 {dimension_numbers = #tpu.dot_dimension_numbers<[1], [0], [0], [1], [0, 0, 1, 1], [], []>} : vector<8x72xf32>, vector<72x256xf32>, vector<8x256xf32> -> vector<8x256xf32>
    %cst_25 = arith.constant 0.000000e+00 : f32
    %36 = vector.broadcast %cst_25 : f32 to vector<8x256xf32>
    %37 = arith.cmpf ogt, %35, %36 : vector<8x256xf32>
    %cst_26 = arith.constant 0.00999999977 : f32
    %38 = vector.broadcast %cst_26 : f32 to vector<8x256xf32>
    %39 = arith.mulf %38, %35 : vector<8x256xf32>
    %40 = arith.select %37, %35, %39 : vector<8x256xi1>, vector<8x256xf32>
    %c0_27 = arith.constant 0 : index
    %c128_28 = arith.constant 128 : index
    %41 = vector.load %arg4[%c0_27, %c128_28] : memref<8x512xf32, #tpu.memory_space<vmem>>, vector<8x256xf32>
    tpu.vector_store %arg4[%c0_27, %c128_28], %40 {strides = array<i32>} : memref<8x512xf32, #tpu.memory_space<vmem>>, vector<8x256xf32>,
    %c0_29 = arith.constant 0 : index
    %c111_30 = arith.constant 111 : index
    %42 = vector.load %arg4[%c0_29, %c111_30] : memref<8x512xf32, #tpu.memory_space<vmem>>, vector<8x256xf32>
    %cst_31 = arith.constant 0.000000e+00 : f32
    %43 = vector.broadcast %cst_31 : f32 to vector<8x256xf32>
    %44 = arith.select %4, %42, %43 : vector<8x256xi1>, vector<8x256xf32>
    %c0_32 = arith.constant 0 : index
    %c112_33 = arith.constant 112 : index
    %45 = vector.load %arg4[%c0_32, %c112_33] : memref<8x512xf32, #tpu.memory_space<vmem>>, vector<8x256xf32>
    %c0_34 = arith.constant 0 : index
    %c113_35 = arith.constant 113 : index
    %46 = vector.load %arg4[%c0_34, %c113_35] : memref<8x512xf32, #tpu.memory_space<vmem>>, vector<8x256xf32>
    %cst_36 = arith.constant 0.000000e+00 : f32
    %47 = vector.broadcast %cst_36 : f32 to vector<8x256xf32>
    %48 = arith.select %6, %46, %47 : vector<8x256xi1>, vector<8x256xf32>
    %c0_37 = arith.constant 0 : index
    %c127_38 = arith.constant 127 : index
    %49 = vector.load %arg4[%c0_37, %c127_38] : memref<8x512xf32, #tpu.memory_space<vmem>>, vector<8x256xf32>
    %cst_39 = arith.constant 0.000000e+00 : f32
    %50 = vector.broadcast %cst_39 : f32 to vector<8x256xf32>
    %51 = arith.select %4, %49, %50 : vector<8x256xi1>, vector<8x256xf32>
    %c0_40 = arith.constant 0 : index
    %c128_41 = arith.constant 128 : index
    %52 = vector.load %arg4[%c0_40, %c128_41] : memref<8x512xf32, #tpu.memory_space<vmem>>, vector<8x256xf32>
    %c0_42 = arith.constant 0 : index
    %c129_43 = arith.constant 129 : index
    %53 = vector.load %arg4[%c0_42, %c129_43] : memref<8x512xf32, #tpu.memory_space<vmem>>, vector<8x256xf32>
    %cst_44 = arith.constant 0.000000e+00 : f32
    %54 = vector.broadcast %cst_44 : f32 to vector<8x256xf32>
    %55 = arith.select %6, %53, %54 : vector<8x256xi1>, vector<8x256xf32>
    %c0_45 = arith.constant 0 : index
    %c143_46 = arith.constant 143 : index
    %56 = vector.load %arg4[%c0_45, %c143_46] : memref<8x512xf32, #tpu.memory_space<vmem>>, vector<8x256xf32>
    %cst_47 = arith.constant 0.000000e+00 : f32
    %57 = vector.broadcast %cst_47 : f32 to vector<8x256xf32>
    %58 = arith.select %4, %56, %57 : vector<8x256xi1>, vector<8x256xf32>
    %c0_48 = arith.constant 0 : index
    %c144_49 = arith.constant 144 : index
    %59 = vector.load %arg4[%c0_48, %c144_49] : memref<8x512xf32, #tpu.memory_space<vmem>>, vector<8x256xf32>
    %c0_50 = arith.constant 0 : index
    %c145_51 = arith.constant 145 : index
    %60 = vector.load %arg4[%c0_50, %c145_51] : memref<8x512xf32, #tpu.memory_space<vmem>>, vector<8x256xf32>
    %cst_52 = arith.constant 0.000000e+00 : f32
    %61 = vector.broadcast %cst_52 : f32 to vector<8x256xf32>
    %62 = arith.select %6, %60, %61 : vector<8x256xi1>, vector<8x256xf32>
    %63 = tpu.concatenate %44, %45, %48, %51, %52, %55, %58, %59, %62 in 0 : vector<8x256xf32>, vector<8x256xf32>, vector<8x256xf32>, vector<8x256xf32>, vector<8x256xf32>, vector<8x256xf32>, vector<8x256xf32>, vector<8x256xf32>, vector<8x256xf32> -> vector<72x256xf32>
    %c0_53 = arith.constant 0 : index
    %c0_54 = arith.constant 0 : index
    %64 = vector.load %arg2[%c0_53, %c0_54] : memref<8x72xf32, #tpu.memory_space<vmem>>, vector<8x72xf32>
    %cst_55 = arith.constant dense<0.000000e+00> : vector<8x256xf32>
    %65 = tpu.matmul %64, %63, %cst_55 {dimension_numbers = #tpu.dot_dimension_numbers<[1], [0], [0], [1], [0, 0, 1, 1], [], []>} : vector<8x72xf32>, vector<72x256xf32>, vector<8x256xf32> -> vector<8x256xf32>
    %66 = arith.negf %65 : vector<8x256xf32>
    %67 = math.exp %66 : vector<8x256xf32>
    %cst_56 = arith.constant 1.000000e+00 : f32
    %68 = vector.broadcast %cst_56 : f32 to vector<8x256xf32>
    %69 = arith.addf %68, %67 : vector<8x256xf32>
    %70 = arith.divf %68, %69 : vector<8x256xf32>
    %c0_57 = arith.constant 0 : index
    %c0_58 = arith.constant 0 : index
    %71 = vector.load %arg3[%c0_57, %c0_58] : memref<8x256xf32, #tpu.memory_space<vmem>>, vector<8x256xf32>
    tpu.vector_store %arg3[%c0_57, %c0_58], %70 {strides = array<i32>} : memref<8x256xf32, #tpu.memory_space<vmem>>, vector<8x256xf32>,
    return
  }
}

</mosaic_0001>

<bundles_post_ra>
// kernel: tpu_custom_call.1
= control target key start
LH: loop header
LB: loop body
LE: loop exit
PB: predicated region body
PF: predicated region fallthrough
CT: control target
= control target key end

     0   :  { %8 = vsyncpa [#allocation4], 0  ;;  %s1028_s0 = inlined_call_operand.hbm [shape: f32[8,256], index: 0, kind: input, shape index: {}]   ;;  %s1029_s1 = inlined_call_operand.hbm [shape: f32[8,72], index: 1, kind: input, shape index: {}]   ;;  %s1030_s2 = inlined_call_operand.hbm [shape: f32[8,72], index: 2, kind: input, shape index: {}]   ;;  %s1031_s3 = inlined_call_operand.hbm [shape: f32[8,256], index: 3, kind: output, shape index: {}]  }
   0x1   :  { %9 = vsyncpa [#allocation7], 0 }
   0x2   :  { %10 = vsyncpa [#allocation5], 0  ;;  %s732_s12 = smov [#allocation6]   ;;  %s733_s14 = smov [#allocation3]  }
   0x3   :  { %s27_s13 = sshll.u32 %s732_s12, 4  ;;  %s17_s15 = sshll.u32 %s733_s14, 4  ;;  %s28_s13 = int_to_ptr.vmem [resolvable:$true] %s27_s13  ;;  %s18_s15 = int_to_ptr.vmem [resolvable:$true] %s17_s15 }
   0x4   :  { %s638_s18 = scalar_lea.hbm %s1029_s1, 128 }
   0x5   :  { %p639_p0 = scmp.ne.s32.totalorder %s1029_s1, %s638_s18  ;;  %p642_p1 = scmp.lt.u32.totalorder %s638_s18, %s1029_s1 }
   0x7   :  { %p644_p2 = pnand %p642_p1, %p639_p0 }
   0x9   :  { %647 = shalt.err (!%p644_p2)
}
   0xa   :  { %s648_s23 = scalar_lea.vmem %s28_s13, 128  ;;  %p653_p4 = scmp.lt.s32.totalorder %s28_s13, %s28_s13 }
   0xb   :  { %p649_p3 = scmp.ne.s32.totalorder %s28_s13, %s648_s23  ;;  %p654_p5 = scmp.lt.s32.totalorder %s648_s23, %s648_s23 }
   0xd   :  { %p655_p6 = por %p654_p5, %p653_p4 }
   0xf   :  { %p656_p7 = pnand %p655_p6, %p649_p3 }
  0x11   :  { %659 = shalt.err (!%p656_p7)
}
  0x12   :  { %30 = dma.hbm_to_vmem [thread:$0]  %s1029_s1, 128, %s28_s13, [#allocation7]  }
  0x13   :  { %s660_s28 = scalar_lea.hbm %s1028_s0, 256 }
  0x14   :  { %p661_p8 = scmp.ne.s32.totalorder %s1028_s0, %s660_s28  ;;  %p664_p9 = scmp.lt.u32.totalorder %s660_s28, %s1028_s0 }
  0x16   :  { %p666_p10 = pnand %p664_p9, %p661_p8 }
  0x18   :  { %669 = shalt.err (!%p666_p10)
}
  0x19   :  { %s670_s6 = scalar_lea.vmem %s18_s15, 256  ;;  %p675_p12 = scmp.lt.s32.totalorder %s18_s15, %s18_s15 }
  0x1a   :  { %p671_p11 = scmp.ne.s32.totalorder %s18_s15, %s670_s6  ;;  %p676_p13 = scmp.lt.s32.totalorder %s670_s6, %s670_s6 }
  0x1c   :  { %p677_p0 = por %p676_p13, %p675_p12 }
  0x1e   :  { %p678_p1 = pnand %p677_p0, %p671_p11 }
  0x20   :  { %681 = shalt.err (!%p678_p1)
}
  0x21   :  { %20 = dma.hbm_to_vmem [thread:$0]  %s1028_s0, 256, %s18_s15, [#allocation4]  }
  0x22   :  { %s734_s8 = smov [#allocation8]   ;;  %s682_s12 = scalar_lea.hbm %s1030_s2, 128 }
  0x23   :  { %s37_s9 = sshll.u32 %s734_s8, 4  ;;  %p683_p2 = scmp.ne.s32.totalorder %s1030_s2, %s682_s12  ;;  %s38_s9 = int_to_ptr.vmem [resolvable:$true] %s37_s9 }
  0x24   :  { %p686_p3 = scmp.lt.u32.totalorder %s682_s12, %s1030_s2 }
  0x26   :  { %p688_p4 = pnand %p686_p3, %p683_p2 }
  0x28   :  { %691 = shalt.err (!%p688_p4)
}
  0x29   :  { %s692_s18 = scalar_lea.vmem %s38_s9, 128  ;;  %p697_p6 = scmp.lt.s32.totalorder %s38_s9, %s38_s9 }
  0x2a   :  { %p693_p5 = scmp.ne.s32.totalorder %s38_s9, %s692_s18  ;;  %p698_p7 = scmp.lt.s32.totalorder %s692_s18, %s692_s18 }
  0x2c   :  { %p699_p8 = por %p698_p7, %p697_p6 }
  0x2e   :  { %p700_p9 = pnand %p699_p8, %p693_p5 }
  0x30   :  { %703 = shalt.err (!%p700_p9)
}
  0x31   :  { %40 = dma.hbm_to_vmem [thread:$0]  %s1030_s2, 128, %s38_s9, [#allocation7]  }
  0x32   :  { %726 = dma.done.wait [#allocation4], 256  }
  0x33   :  { %727 = vsyncadd [#allocation4], 4294967040 }
  0x34   :  { %728 = dma.done.wait [#allocation7], 256  }
  0x35   :  { %729 = vsyncadd [#allocation7], 4294967040  ;;  %v735_v0 = vmov 0.0   ;;  %s736_s19 = smov 17   ;;  %s737_s20 = smov 16   ;;  %v808_v1 = vld [vmem:[#allocation3] sm:$0xff]  ;;  %v50_v5 = vlaneseq }
  0x36   :  { %71 = vrot.lane.b32.xlu1 %v735_v0, %s736_s19  ;;  %246 = vmatprep.mubr.f32.mxu0 %v735_v0  ;;  %v810_v2 = vld [vmem:[#allocation3 + $0x8] sm:$0xff]  ;;  %s738_s2 = smov 1   ;;  %s739_s21 = smov 15   ;;  %vm77_vm0 = vcmask 138240   ;;  %vm161_vm2 = vcmask 130048   ;;  %vm103_vm4 = vcmask 7168  }
  0x37   :  { %433 = vmatprep.mubr.f32.mxu1 %v735_v0  ;;  %v560_v3 = vpack.i.bf16 %v810_v2, %v808_v1  ;;  %s740_s22 = smov 127   ;;  %v590_v4 = vpack.i.bf16 %v735_v0, %v810_v2  ;;  %s741_s23 = smov 112   ;;  %v51_v7 = vand.u32 127, %v50_v5  ;;  %vm744_vm5 = vmmov 1   ;;  %v365_v57 = vld [vmem:[#allocation8] sm:$0xff] }
  0x38   :  { %s742_s24 = smov 113   ;;  %s743_s25 = smov 111   ;;  %vm90_vm8 = vcmask 121856   ;;  %vm1033_vm13 = vcmask 1039360   ;;  %vm1034_vm14 = vcmask 916480  }
  0x39   :  { %561 = vrot.lane.b32.xlu0 %v560_v3, %s736_s19  ;;  %v52_v9 = vadd.s32 128, %v51_v7  ;;  %v53_v13 = vand.u32 15, %v51_v7  ;;  %s745_s26 = smov [#allocation9]  }
  0x3a   :  { %155 = vrot.lane.b32.xlu1 %v735_v0, %s737_s20  ;;  %s460_s27 = sshll.u32 %s745_s26, 4  ;;  %s461_s27 = int_to_ptr.vmem [resolvable:$true] %s460_s27 }
  0x3b   :  { %v54_v12 = vand.u32 15, %v52_v9  ;;  %vm851_vm3 = vcmp.ne.s32.totalorder %v53_v13, 0  ;;  %vm880_vm10 = vcmp.ne.s32.totalorder %v53_v13, 15  ;;  %v177_v9 = vld [vmem:[#allocation6] sm:$0xff]  ;;  %s704_s28 = scalar_lea.vmem %s461_s27, 256  ;;  %p709_p11 = scmp.lt.s32.totalorder %s461_s27, %s461_s27 }
  0x3c   :  { %vm869_vm7 = vmpackc.low %vm744_vm5, %vm851_vm3  ;;  %p705_p10 = scmp.ne.s32.totalorder %s461_s27, %s704_s28  ;;  %p710_p12 = scmp.lt.s32.totalorder %s704_s28, %s704_s28 }
  0x3d   :  { %566 = vrot.lane.b32.xlu0 %v560_v3, %s737_s20  ;;  %vm847_vm1 = vcmp.ne.s32.totalorder %v54_v12, 0  ;;  %vm873_vm9 = vcmp.ne.s32.totalorder %v54_v12, 15  ;;  %vm1032_vm12 = vmpackc.low %vm851_vm3, %vm880_vm10 }
  0x3e   :  { %576 = vrot.lane.b32.xlu1 %v560_v3, %s738_s2  ;;  %vm860_vm6 = vmpackc.low %vm744_vm5, %vm847_vm1  ;;  %p711_p13 = por %p710_p12, %p709_p11 }
  0x3f   :  { %vm1036_vm11 = vmpackc.low %vm847_vm1, %vm873_vm9 }
  0x40   :  { %vm912_vm15 = vmpackc.low %vm873_vm9, %vm744_vm5  ;;  %p712_p0 = pnand %p711_p13, %p705_p10 }
  0x41   :  { %571 = vrot.lane.b32.xlu0 %v560_v3, %s739_s21 }
  0x42   :  { %97 = vrot.lane.b32.xlu1 %v735_v0, %s738_s2 }
  0x45   :  { %84 = vrot.lane.b32.xlu0 %v735_v0, %s739_s21 }
  0x46   :  { %116 = vrot.lane.b32.xlu1 %v808_v1, %s740_s22 }
  0x49   :  { %581 = vrot.lane.b32.xlu0 %v590_v4, %s740_s22 }
  0x4a   :  { %591 = vrot.lane.b32.xlu1 %v590_v4, %s741_s23 }
  0x4d   :  { %586 = vrot.lane.b32.xlu0 %v590_v4, %s742_s24 }
  0x4e   :  { %166 = vrot.lane.b32.xlu1 %v808_v1, %s741_s23 }
  0x51   :  { %129 = vrot.lane.b32.xlu0 %v808_v1, %s742_s24 }
  0x52   :  { %146 = vrot.lane.b32.xlu1 %v735_v0, %s743_s25 }
  0x55   :  { %144 = vrot.lane.b32.xlu0 %v810_v2, %s743_s25 }
  0x56   :  { %267 = vrot.lane.b32.xlu1 %v735_v0, %s736_s19 }
  0x59   :  { %142 = vrot.lane.b32.xlu0 %v808_v1, %s743_s25 }
  0x5a   :  { %279 = vrot.lane.b32.xlu1 %v735_v0, %s739_s21 }
  0x5d   :  { %345 = vrot.lane.b32.xlu0 %v735_v0, %s737_s20 }
  0x61   :  { %291 = vrot.lane.b32.xlu0 %v735_v0, %s738_s2 }
  0xa8   :  { %v72_v6 = vpop.permute.xlu1 %71 }
  0xab   :  { %v562_v10 = vpop.permute.xlu0 %561 }
  0xac   :  { %v156_v8 = vpop.permute.xlu1 %155  ;;  %v564_v14 = vunpack.i.h.bf16 %v562_v10  ;;  %v563_v15 = vunpack.i.l.bf16 %v562_v10 }
  0xae   :  { %v79_v24 = vsel %vm77_vm0, %v563_v15, %v564_v14  ;;  %v78_v27 = vsel %vm77_vm0, %v72_v6, %v563_v15 }
  0xaf   :  { %v567_v16 = vpop.permute.xlu0 %566 }
  0xb0   :  { %v577_v11 = vpop.permute.xlu1 %576  ;;  %v569_v20 = vunpack.i.h.bf16 %v567_v16  ;;  %v568_v21 = vunpack.i.l.bf16 %v567_v16 }
  0xb1   :  { %v579_v22 = vunpack.i.h.bf16 %v577_v11  ;;  %v578_v23 = vunpack.i.l.bf16 %v577_v11 }
  0xb2   :  { %v163_v25 = vsel %vm161_vm2, %v568_v21, %v569_v20  ;;  %v162_v28 = vsel %vm161_vm2, %v156_v8, %v568_v21 }
  0xb3   :  { %v572_v29 = vpop.permute.xlu0 %571  ;;  %v498_v30 = vpack.c.bf16 %v163_v25, %v79_v24  ;;  %v501_v31 = vpack.c.bf16 %v162_v28, %v78_v27  ;;  %v105_v37 = vsel %vm103_vm4, %v578_v23, %v579_v22 }
  0xb4   :  { %v98_v19 = vpop.permute.xlu1 %97  ;;  %v574_v35 = vunpack.i.h.bf16 %v572_v29  ;;  %v573_v36 = vunpack.i.l.bf16 %v572_v29 }
  0xb5   :  { %500 = vmatprep.subr.msk.bf16.mxu0 %vm860_vm6, %v498_v30  ;;  %v104_v39 = vsel %vm103_vm4, %v98_v19, %v578_v23 }
  0xb6   :  { %503 = vmatpush1.bf16.msk.msra.mxu0 %vm869_vm7, %v501_v31  ;;  %v92_v40 = vsel %vm90_vm8, %v573_v36, %v574_v35 }
  0xb7   :  { %v85_v41 = vpop.permute.xlu0 %84  ;;  %v504_v42 = vpack.c.bf16 %v105_v37, %v92_v40 }
  0xb8   :  { %v117_v34 = vpop.permute.xlu1 %116  ;;  %v91_v43 = vsel %vm90_vm8, %v85_v41, %v573_v36 }
  0xb9   :  { %v507_v44 = vpack.c.bf16 %v104_v39, %v91_v43  ;;  %506 = vmatprep.subr.msk.bf16.mxu0 %vm1036_vm11, %v504_v42 }
  0xbb   :  { %v582_v46 = vpop.permute.xlu0 %581  ;;  %509 = vmatpush1.bf16.msk.msra.mxu0 %vm1032_vm12, %v507_v44  ;;  %vm921_vm12 = vmpackc.low %vm880_vm10, %vm744_vm5  ;;  %vm148_vm5 = vcmask 908288  }
  0xbc   :  { %v592_v45 = vpop.permute.xlu1 %591  ;;  %v584_v47 = vunpack.i.h.bf16 %v582_v46  ;;  %v583_v48 = vunpack.i.l.bf16 %v582_v46 }
  0xbd   :  { %v594_v49 = vunpack.i.h.bf16 %v592_v45  ;;  %v593_v50 = vunpack.i.l.bf16 %v592_v45 }
  0xbe   :  { %v123_v51 = vsel %vm1033_vm13, %v117_v34, %v583_v48  ;;  %v124_v52 = vsel %vm1033_vm13, %v583_v48, %v584_v47  ;;  %vm1035_vm13 = vcmask 924672  }
  0xbf   :  { %v510_v54 = vpack.c.bf16 %v124_v52, %v810_v2  ;;  %v513_v55 = vpack.c.bf16 %v123_v51, %v808_v1  ;;  %v587_v56 = vpop.permute.xlu0 %586  ;;  %v174_v61 = vsel %vm1034_vm14, %v593_v50, %v594_v49 }
  0xc0   :  { %v167_v58 = vpop.permute.xlu1 %166  ;;  %v589_v59 = vunpack.i.h.bf16 %v587_v56  ;;  %v588_v60 = vunpack.i.l.bf16 %v587_v56 }
  0xc1   :  { %512 = vmatprep.subr.msk.bf16.mxu0 %vm912_vm15, %v510_v54  ;;  %v173_v62 = vsel %vm1034_vm14, %v167_v58, %v593_v50  ;;  %vm178_vm14 = vcmask 588800  }
  0xc2   :  { %515 = vmatpush1.bf16.msk.msra.mxu0 %vm921_vm12, %v513_v55  ;;  %v137_v63 = vsel %vm1035_vm13, %v588_v60, %v589_v59 }
  0xc3   :  { %v130_v1 = vpop.permute.xlu0 %129  ;;  %v516_v2 = vpack.c.bf16 %v174_v61, %v137_v63 }
  0xc4   :  { %v136_v3 = vsel %vm1035_vm13, %v130_v1, %v588_v60  ;;  %v147_v5 = vpop.permute.xlu1 %146 }
  0xc5   :  { %v519_v4 = vpack.c.bf16 %v173_v62, %v136_v3  ;;  %518 = vmatprep.subr.msk.bf16.mxu0 %vm860_vm6, %v516_v2 }
  0xc7   :  { %v145_v6 = vpop.permute.xlu0 %144  ;;  %521 = vmatpush1.bf16.msk.msra.mxu0 %vm869_vm7, %v519_v4 }
  0xc8   :  { %v150_v7 = vsel %vm148_vm5, %v145_v6, %v147_v5  ;;  %v268_v21 = vpop.permute.xlu1 %267 }
  0xc9   :  { %480 = vmatprep.subr.msk.mxu0 %vm873_vm9, %v150_v7 }
  0xcb   :  { %v143_v8 = vpop.permute.xlu0 %142 }
  0xcc   :  { %v149_v10 = vsel %vm148_vm5, %v143_v8, %v145_v6  ;;  %v280_v23 = vpop.permute.xlu1 %279 }
  0xcd   :  { %481 = vmatpush1.msk.msra.mxu0 %vm880_vm10, %v149_v10 }
  0xce   :  { %482 = vmatmul.mubr.msk.f32.vlgmr.msra.gmra.mrb[0].mxu0 %vm178_vm14, %v177_v9 }
  0xcf   :  { %v346_v22 = vpop.permute.xlu0 %345 }
  0xd3   :  { %v292_v24 = vpop.permute.xlu0 %291 }
 0x1a1   :  { %v248_v11 = vpop.f32.mrb[0].mxu0 }
 0x1a2   :  { %vm253_vm13 = vcmp.gt.f32.partialorder %v248_v11, 0.0  ;;  %v255_v12 = vmul.f32 0.01, %v248_v11  ;;  %v250_v13 = vpop.f32.mrb[1].mxu0 }
 0x1a3   :  { %vm254_vm11 = vcmp.gt.f32.partialorder %v250_v13, 0.0  ;;  %v256_v14 = vmul.f32 0.01, %v250_v13 }
 0x1a4   :  { %v944_v15 = vsel %vm253_vm13, %v248_v11, %v255_v12 }
 0x1a5   :  { %v946_v16 = vsel %vm254_vm11, %v250_v13, %v256_v14  ;;  %vm1059_vm11 = vcmask 924672  }
 0x1a6   :  { %v600_v19 = vpack.i.bf16 %v946_v16, %v944_v15  ;;  %v625_v20 = vpack.i.bf16 %v735_v0, %v946_v16  ;;  %vm1060_vm13 = vmmov %vm1059_vm11 }
 0x1a8   :  { %601 = vrot.lane.b32.xlu0 %v600_v19, %s737_s20  ;;  %596 = vrot.lane.b32.xlu1 %v600_v19, %s736_s19 }
 0x1ac   :  { %611 = vrot.lane.b32.xlu0 %v600_v19, %s738_s2  ;;  %606 = vrot.lane.b32.xlu1 %v600_v19, %s739_s21 }
 0x1b0   :  { %309 = vrot.lane.b32.xlu0 %v944_v15, %s740_s22  ;;  %321 = vrot.lane.b32.xlu1 %v944_v15, %s742_s24 }
 0x1b4   :  { %626 = vrot.lane.b32.xlu0 %v625_v20, %s741_s23  ;;  %616 = vrot.lane.b32.xlu1 %v625_v20, %s740_s22 }
 0x1b8   :  { %355 = vrot.lane.b32.xlu0 %v944_v15, %s741_s23  ;;  %621 = vrot.lane.b32.xlu1 %v625_v20, %s742_s24 }
 0x1bc   :  { %337 = vrot.lane.b32.xlu0 %v735_v0, %s743_s25  ;;  %335 = vrot.lane.b32.xlu1 %v946_v16, %s743_s25 }
 0x1c0   :  { %333 = vrot.lane.b32.xlu1 %v944_v15, %s743_s25 }
 0x21a   :  { %v602_v25 = vpop.permute.xlu0 %601  ;;  %v597_v27 = vpop.permute.xlu1 %596 }
 0x21b   :  { %v604_v28 = vunpack.i.h.bf16 %v602_v25  ;;  %v603_v29 = vunpack.i.l.bf16 %v602_v25  ;;  %v599_v30 = vunpack.i.h.bf16 %v597_v27  ;;  %v598_v31 = vunpack.i.l.bf16 %v597_v27 }
 0x21d   :  { %v274_v34 = vsel %vm77_vm0, %v598_v31, %v599_v30  ;;  %v352_v0 = vsel %vm161_vm2, %v603_v29, %v604_v28  ;;  %v273_v35 = vsel %vm77_vm0, %v268_v21, %v598_v31  ;;  %v351_v36 = vsel %vm161_vm2, %v346_v22, %v603_v29  ;;  %vm1053_vm0 = vmpackc.low %vm847_vm1, %vm873_vm9 }
 0x21e   :  { %v612_v37 = vpop.permute.xlu0 %611  ;;  %v607_v39 = vpop.permute.xlu1 %606  ;;  %v522_v40 = vpack.c.bf16 %v352_v0, %v274_v34  ;;  %v525_v41 = vpack.c.bf16 %v351_v36, %v273_v35  ;;  %vm1054_vm2 = vmpackc.low %vm851_vm3, %vm880_vm10  ;;  %vm1057_vm1 = vcmask 916480  }
 0x21f   :  { %v614_v42 = vunpack.i.h.bf16 %v612_v37  ;;  %v613_v43 = vunpack.i.l.bf16 %v612_v37  ;;  %v609_v44 = vunpack.i.h.bf16 %v607_v39  ;;  %v608_v45 = vunpack.i.l.bf16 %v607_v39  ;;  %vm1058_vm3 = vmmov %vm1057_vm1 }
 0x220   :  { %524 = vmatprep.subr.msk.bf16.mxu1 %vm860_vm6, %v522_v40 }
 0x221   :  { %v297_v46 = vsel %vm103_vm4, %v292_v24, %v613_v43  ;;  %v298_v47 = vsel %vm103_vm4, %v613_v43, %v614_v42  ;;  %v285_v48 = vsel %vm90_vm8, %v280_v23, %v608_v45  ;;  %v286_v49 = vsel %vm90_vm8, %v608_v45, %v609_v44  ;;  %527 = vmatpush1.bf16.msk.msra.mxu1 %vm869_vm7, %v525_v41 }
 0x222   :  { %v528_v50 = vpack.c.bf16 %v298_v47, %v286_v49  ;;  %v531_v51 = vpack.c.bf16 %v297_v46, %v285_v48  ;;  %v310_v52 = vpop.permute.xlu0 %309  ;;  %v322_v54 = vpop.permute.xlu1 %321  ;;  %vm1055_vm4 = vcmask 1039360  }
 0x223   :  { %vm1056_vm8 = vmmov %vm1055_vm4 }
 0x224   :  { %530 = vmatprep.subr.msk.bf16.mxu1 %vm1053_vm0, %v528_v50 }
 0x225   :  { %533 = vmatpush1.bf16.msk.msra.mxu1 %vm1054_vm2, %v531_v51 }
 0x226   :  { %v627_v55 = vpop.permute.xlu0 %626  ;;  %v617_v56 = vpop.permute.xlu1 %616 }
 0x227   :  { %v619_v58 = vunpack.i.h.bf16 %v617_v56  ;;  %v618_v59 = vunpack.i.l.bf16 %v617_v56  ;;  %v629_v60 = vunpack.i.h.bf16 %v627_v55  ;;  %v628_v61 = vunpack.i.l.bf16 %v627_v55 }
 0x229   :  { %v315_v62 = vsel %vm1055_vm4, %v310_v52, %v618_v59  ;;  %v316_v17 = vsel %vm1056_vm8, %v618_v59, %v619_v58  ;;  %v362_v5 = vsel %vm1057_vm1, %v628_v61, %v629_v60 }
 0x22a   :  { %v534_v63 = vpack.c.bf16 %v316_v17, %v946_v16  ;;  %v537_v1 = vpack.c.bf16 %v315_v62, %v944_v15  ;;  %v356_v2 = vpop.permute.xlu0 %355  ;;  %v622_v18 = vpop.permute.xlu1 %621 }
 0x22b   :  { %v624_v3 = vunpack.i.h.bf16 %v622_v18  ;;  %v623_v4 = vunpack.i.l.bf16 %v622_v18  ;;  %v361_v6 = vsel %vm1058_vm3, %v356_v2, %v628_v61 }
 0x22c   :  { %536 = vmatprep.subr.msk.bf16.mxu1 %vm912_vm15, %v534_v63 }
 0x22d   :  { %v327_v7 = vsel %vm1059_vm11, %v322_v54, %v623_v4  ;;  %v328_v8 = vsel %vm1060_vm13, %v623_v4, %v624_v3  ;;  %539 = vmatpush1.bf16.msk.msra.mxu1 %vm921_vm12, %v537_v1 }
 0x22e   :  { %v540_v9 = vpack.c.bf16 %v362_v5, %v328_v8  ;;  %v543_v10 = vpack.c.bf16 %v361_v6, %v327_v7  ;;  %v338_v11 = vpop.permute.xlu0 %337  ;;  %v336_v12 = vpop.permute.xlu1 %335 }
 0x22f   :  { %v340_v53 = vsel %vm148_vm5, %v336_v12, %v338_v11 }
 0x230   :  { %542 = vmatprep.subr.msk.bf16.mxu1 %vm860_vm6, %v540_v9 }
 0x231   :  { %545 = vmatpush1.bf16.msk.msra.mxu1 %vm869_vm7, %v543_v10 }
 0x232   :  { %v334_v13 = vpop.permute.xlu1 %333  ;;  %493 = vmatprep.subr.msk.mxu1 %vm873_vm9, %v340_v53 }
 0x233   :  { %v339_v14 = vsel %vm148_vm5, %v334_v13, %v336_v12 }
 0x235   :  { %494 = vmatpush1.msk.msra.mxu1 %vm880_vm10, %v339_v14 }
 0x236   :  { %495 = vmatmul.mubr.msk.f32.vlgmr.msra.gmra.mrb[0].mxu1 %vm178_vm14, %v365_v57 }
 0x309   :  { %v435_v15 = vpop.f32.mrb[0].mxu1 }
 0x30a   :  { %v496_v26 = vmul.f32 -1.442695, %v435_v15  ;;  %v437_v16 = vpop.f32.mrb[1].mxu1 }
 0x30b   :  { %v497_v19 = vmul.f32 -1.442695, %v437_v16 }
 0x30c   :  { %630 = vpow2.f32 %v496_v26 }
 0x30d   :  { %632 = vpow2.f32 %v497_v19 }
 0x316   :  { %v631_v32 = vpop.eup %630 }
 0x317   :  { %v633_v20 = vpop.eup %632  ;;  %v446_v21 = vadd.f32 1.0, %v631_v32 }
 0x318   :  { %v447_v22 = vadd.f32 1.0, %v633_v20 }
 0x319   :  { %634 = vrcp.f32 %v446_v21 }
 0x31a   :  { %636 = vrcp.f32 %v447_v22 }
 0x323   :  { %v635_v33 = vpop.eup %634 }
 0x324   :  { %v637_v38 = vpop.eup %636  ;;  %452 = vst [vmem:[#allocation9] sm:$0xff] %v635_v33 }
 0x325   :  { %453 = vst [vmem:[#allocation9 + $0x8] sm:$0xff] %v637_v38 }
 0x326   :  { %715 = shalt.err (!%p712_p0)
}
 0x327   :  { %s716_s4 = scalar_lea.hbm %s1031_s3, 256 }
 0x328   :  { %p717_p1 = scmp.ne.s32.totalorder %s1031_s3, %s716_s4  ;;  %p720_p2 = scmp.lt.u32.totalorder %s716_s4, %s1031_s3 }
 0x32a   :  { %p722_p3 = pnand %p720_p2, %p717_p1 }
 0x32c   :  { %725 = shalt.err (!%p722_p3)
}
 0x32d   :  { %463 = dma.vmem_to_hbm [thread:$0]  %s461_s27, 256, %s1031_s3, [#allocation5]  }
 0x32e   :  { %730 = dma.done.wait [#allocation5], 256  }
 0x32f   :  { %731 = vsyncadd [#allocation5], 4294967040 }
 0x330   :  { %467 = vsyncpa [#allocation4], 1 }
 0x331   :  { %468 = vsyncpa [#allocation7], 1 }
 0x332   :  { %469 = vsyncpa [#allocation5], 1 }

</bundles_post_ra>
